<compile_context>
chip_gen: v5e
topology: v5e:2x2
jax: 0.10.0
libtpu: 0.0.40
codegen_flags: <defaults>
</compile_context>

<pallas_src>
import functools

import jax
import jax.numpy as jnp
from jax.experimental import pallas as pl
from jax.experimental.pallas import tpu as pltpu


def _round_up(x, m):
    return (x + m - 1) // m * m


def _pad_feature_dim(d):
    # Lane-pad only dims that are already >= one vreg lane width (128).
    # Small streamed dims (e.g. I=32, O=8) stay unpadded: the block's last dim
    # then equals the full array dim (legal BlockSpec), and we avoid 4-16x HBM
    # read/write amplification on the streamed x / out tensors.
    return _round_up(d, 128) if d >= 128 else d


@functools.lru_cache(maxsize=None)
def _vmem_limit_bytes():
    # ~75% of physical per-core VMEM: ~48 MiB on v7x (64 MiB phys), ~96 MiB on
    # v5e/v6e (128 MiB phys). Leaves headroom for compiler-internal scratch.
    try:
        cap = int(pltpu.get_tpu_info().vmem_capacity_bytes)
    except Exception:
        cap = 64 * 1024 * 1024  # conservative: v7x physical per-core VMEM
    return cap * 3 // 4


def mlp_kernel(x_ref, w1_ref, b1_ref, w2_ref, b2_ref, o_ref):
    """Fused relu(x @ w1 + b1) @ w2 + b2 for one (TM, I) batch tile."""
    h = jnp.dot(x_ref[...], w1_ref[...], preferred_element_type=jnp.float32)
    h = h + b1_ref[...]            # f32 bias broadcast [1, Hp] over [TM, Hp]
    h = jnp.maximum(h, 0.0)        # ReLU, f32 epilogue
    # Deliberate cast of the activations for the second MXU pass (no-op for
    # f32 weights; selects bf16 operands on the bf16 path).
    h = h.astype(w2_ref.dtype)
    y = jnp.dot(h, w2_ref[...], preferred_element_type=jnp.float32)
    y = y + b2_ref[...]            # f32 bias broadcast [1, Op] over [TM, Op]
    o_ref[...] = y.astype(o_ref.dtype)


def prepare_mlp_params(w1, b1, w2, b2, *, compute_dtype=None):
    """Pad / lay out the weights ONCE (hoisted out of the per-call forward).

    w1: [I, H], b1: [H], w2: [H, O], b2: [O]  (transposed vs PyTorch's
    nn.Linear [out, in] layout).  compute_dtype=jnp.bfloat16 selects the bf16
    MXU-operand path; biases always stay f32 for the f32 epilogue.
    """
    I, H = w1.shape
    O = w2.shape[1]
    Ip, Hp, Op = _pad_feature_dim(I), _pad_feature_dim(H), _pad_feature_dim(O)
    wd = jnp.dtype(compute_dtype) if compute_dtype is not None else w1.dtype

    w1p = jnp.zeros((Ip, Hp), wd).at[:I, :H].set(w1.astype(wd))
    b1p = jnp.zeros((1, Hp), jnp.float32).at[0, :H].set(
        jnp.reshape(b1, (H,)).astype(jnp.float32))
    w2p = jnp.zeros((Hp, Op), wd).at[:H, :O].set(w2.astype(wd))
    b2p = jnp.zeros((1, Op), jnp.float32).at[0, :O].set(
        jnp.reshape(b2, (O,)).astype(jnp.float32))
    return {"w1": w1p, "b1": b1p, "w2": w2p, "b2": b2p, "dims": (I, H, O)}


def mlp_classifier_forward(x, params, *, block_m=512):
    """Eval-mode MLPClassifier forward (dropout == identity).

    x: [B, I] -> [B, O]; `params` comes from prepare_mlp_params().
    """
    w1p, b1p, w2p, b2p = params["w1"], params["b1"], params["w2"], params["b2"]
    I, H, O = params["dims"]
    Ip, Hp = w1p.shape
    Op = w2p.shape[1]
    B = x.shape[0]
    assert x.shape[1] == I, (x.shape, I)
    out_dtype = x.dtype

    # Batch tiling: big tiles amortize the ~0.35us per-grid-step overhead, but
    # keep >= 2 grid steps when B allows so the "parallel" batch axis can
    # shard across v7x's two TensorCores (harmless on single-TC v5e/v6e).
    n_tiles = max(2, int(pl.cdiv(B, block_m))) if B > 8 else 1
    TM = min(block_m, _round_up(int(pl.cdiv(B, n_tiles)), 8))
    Bp = _round_up(B, TM)
    grid = (Bp // TM,)

    # Only the batch dim (and, when I >= 128, the lane dim) of the streamed x
    # is padded; small I stays unpadded to avoid HBM traffic amplification.
    xs = x.astype(w1p.dtype)
    if (Bp, Ip) != (B, I):
        xp = jnp.zeros((Bp, Ip), xs.dtype).at[:B, :I].set(xs)
    else:
        xp = xs

    # Advisory cost estimate so XLA can schedule neighbouring ops around the
    # custom call.
    bytes_accessed = (
        xp.size * xp.dtype.itemsize
        + w1p.size * w1p.dtype.itemsize + w2p.size * w2p.dtype.itemsize
        + b1p.size * b1p.dtype.itemsize + b2p.size * b2p.dtype.itemsize
        + Bp * Op * jnp.dtype(out_dtype).itemsize)
    cost = pl.CostEstimate(flops=2 * B * (I * H + H * O),
                           transcendentals=0,
                           bytes_accessed=int(bytes_accessed))

    def _call(single_buffer_weights):
        # Weights/biases: constant index_map -> DMA'd once, VMEM-resident for
        # the whole batch loop.  Single-buffering them halves their VMEM
        # footprint (matters most on v7x); x/out keep default double-buffering
        # so their DMA overlaps with compute.
        w_kw = ({"pipeline_mode": pl.Buffered(buffer_count=1)}
                if single_buffer_weights else {})
        in_specs = [
            pl.BlockSpec((TM, Ip), lambda i: (i, 0)),          # streamed x
            pl.BlockSpec((Ip, Hp), lambda i: (0, 0), **w_kw),  # w1 (resident)
            pl.BlockSpec((1, Hp), lambda i: (0, 0), **w_kw),   # b1 (resident)
            pl.BlockSpec((Hp, Op), lambda i: (0, 0), **w_kw),  # w2 (resident)
            pl.BlockSpec((1, Op), lambda i: (0, 0), **w_kw),   # b2 (resident)
        ]
        out_specs = pl.BlockSpec((TM, Op), lambda i: (i, 0))   # streamed out
        return pl.pallas_call(
            mlp_kernel,
            out_shape=jax.ShapeDtypeStruct((Bp, Op), out_dtype),
            grid_spec=pl.GridSpec(grid=grid, in_specs=in_specs,
                                  out_specs=out_specs),
            compiler_params=pltpu.CompilerParams(
                dimension_semantics=("parallel",),
                vmem_limit_bytes=_vmem_limit_bytes(),
            ),
            cost_estimate=cost,
        )(xp, w1p, b1p, w2p, b2p)

    try:
        out = _call(True)
    except Exception:
        # pl.Buffered(1) single-buffering is jax-version-dependent; fall back
        # to default double-buffered weight specs (identical numerics).
        out = _call(False)

    if (Bp, Op) != (B, O):
        out = out[:B, :O]
    return out


if __name__ == "__main__":
    # Shapes consistent with the module's forward:
    # input_size=32, hidden_size=64, output_size=8, batch=8, dropout_rate=0.1
    batch, input_size, hidden_size, output_size = 8, 32, 64, 8

    key = jax.random.PRNGKey(0)
    kx, kw1, kb1, kw2, kb2 = jax.random.split(key, 5)

    x = jax.random.normal(kx, (batch, input_size), dtype=jnp.float32)

    # PyTorch nn.Linear default init: U(-1/sqrt(fan_in), 1/sqrt(fan_in)).
    bound1 = 1.0 / (input_size ** 0.5)
    w1 = jax.random.uniform(kw1, (input_size, hidden_size),
                            minval=-bound1, maxval=bound1, dtype=jnp.float32)
    b1 = jax.random.uniform(kb1, (hidden_size,),
                            minval=-bound1, maxval=bound1, dtype=jnp.float32)

    bound2 = 1.0 / (hidden_size ** 0.5)
    w2 = jax.random.uniform(kw2, (hidden_size, output_size),
                            minval=-bound2, maxval=bound2, dtype=jnp.float32)
    b2 = jax.random.uniform(kb2, (output_size,),
                            minval=-bound2, maxval=bound2, dtype=jnp.float32)

    # Pure-JAX reference (dropout is identity in eval mode).
    ref = jnp.maximum(x @ w1 + b1[None, :], 0.0) @ w2 + b2[None, :]

    # f32 path: pad/lay out weights once, then run the fused kernel.
    params = prepare_mlp_params(w1, b1, w2, b2)
    out = jax.block_until_ready(mlp_classifier_forward(x, params))
    assert out.shape == (batch, output_size)
    assert jnp.allclose(out, ref, atol=1e-5, rtol=1e-5), (
        float(jnp.max(jnp.abs(out - ref))))

    # Optional bf16 MXU-operand path: halves HBM traffic for x/weights, f32
    # accumulation + f32 bias/ReLU epilogue -> looser tolerance.
    params_bf16 = prepare_mlp_params(w1, b1, w2, b2,
                                     compute_dtype=jnp.bfloat16)
    out_bf16 = jax.block_until_ready(mlp_classifier_forward(x, params_bf16))
    assert out_bf16.shape == (batch, output_size)
    assert jnp.allclose(out_bf16.astype(jnp.float32), ref,
                        atol=5e-2, rtol=5e-2), (
        float(jnp.max(jnp.abs(out_bf16.astype(jnp.float32) - ref))))

    print("KERNEL_OK")
</pallas_src>

<mosaic_0001>
module attributes {stable_mosaic.version = 11 : i64} {
  func.func @mlp_kernel(%arg0: i32, %arg1: memref<8x32xf32, #tpu.memory_space<vmem>>, %arg2: memref<32x64xf32, #tpu.memory_space<vmem>>, %arg3: memref<1x64xf32, #tpu.memory_space<vmem>>, %arg4: memref<64x8xf32, #tpu.memory_space<vmem>>, %arg5: memref<1x8xf32, #tpu.memory_space<vmem>>, %arg6: memref<8x8xf32, #tpu.memory_space<vmem>>) attributes {dimension_semantics = [#tpu.dimension_semantics<parallel>], iteration_bounds = array<i64: 1>, scalar_prefetch = 0 : i64, scratch_operands = 0 : i64, tpu.core_type = #tpu.core_type<tc>, window_params = [{transform_indices = @transform_0, window_bounds = array<i64: 8, 32>}, {pipeline_mode = #tpu.pipeline_mode<synchronous>, transform_indices = @transform_1, window_bounds = array<i64: 32, 64>}, {pipeline_mode = #tpu.pipeline_mode<synchronous>, transform_indices = @transform_2, window_bounds = array<i64: 1, 64>}, {pipeline_mode = #tpu.pipeline_mode<synchronous>, transform_indices = @transform_3, window_bounds = array<i64: 64, 8>}, {pipeline_mode = #tpu.pipeline_mode<synchronous>, transform_indices = @transform_4, window_bounds = array<i64: 1, 8>}, {transform_indices = @transform_5, window_bounds = array<i64: 8, 8>}]} {
    %c0 = arith.constant 0 : index
    %c0_0 = arith.constant 0 : index
    %0 = vector.load %arg1[%c0, %c0_0] : memref<8x32xf32, #tpu.memory_space<vmem>>, vector<8x32xf32>
    %c0_1 = arith.constant 0 : index
    %c0_2 = arith.constant 0 : index
    %1 = vector.load %arg2[%c0_1, %c0_2] : memref<32x64xf32, #tpu.memory_space<vmem>>, vector<32x64xf32>
    %cst = arith.constant dense<0.000000e+00> : vector<8x64xf32>
    %2 = tpu.matmul %0, %1, %cst {dimension_numbers = #tpu.dot_dimension_numbers<[1], [0], [0], [1], [0, 0, 1, 1], [], []>} : vector<8x32xf32>, vector<32x64xf32>, vector<8x64xf32> -> vector<8x64xf32>
    %c0_3 = arith.constant 0 : index
    %c0_4 = arith.constant 0 : index
    %3 = vector.load %arg3[%c0_3, %c0_4] : memref<1x64xf32, #tpu.memory_space<vmem>>, vector<1x64xf32>
    %4 = vector.broadcast %3 : vector<1x64xf32> to vector<8x64xf32>
    %5 = arith.addf %2, %4 : vector<8x64xf32>
    %cst_5 = arith.constant 0.000000e+00 : f32
    %6 = vector.broadcast %cst_5 : f32 to vector<8x64xf32>
    %7 = arith.maximumf %5, %6 : vector<8x64xf32>
    %c0_6 = arith.constant 0 : index
    %c0_7 = arith.constant 0 : index
    %8 = vector.load %arg4[%c0_6, %c0_7] : memref<64x8xf32, #tpu.memory_space<vmem>>, vector<64x8xf32>
    %cst_8 = arith.constant dense<0.000000e+00> : vector<8x8xf32>
    %9 = tpu.matmul %7, %8, %cst_8 {dimension_numbers = #tpu.dot_dimension_numbers<[1], [0], [0], [1], [0, 0, 1, 1], [], []>} : vector<8x64xf32>, vector<64x8xf32>, vector<8x8xf32> -> vector<8x8xf32>
    %c0_9 = arith.constant 0 : index
    %c0_10 = arith.constant 0 : index
    %10 = vector.load %arg5[%c0_9, %c0_10] : memref<1x8xf32, #tpu.memory_space<vmem>>, vector<1x8xf32>
    %11 = vector.broadcast %10 : vector<1x8xf32> to vector<8x8xf32>
    %12 = arith.addf %9, %11 : vector<8x8xf32>
    %c0_11 = arith.constant 0 : index
    %c0_12 = arith.constant 0 : index
    %13 = vector.load %arg6[%c0_11, %c0_12] : memref<8x8xf32, #tpu.memory_space<vmem>>, vector<8x8xf32>
    tpu.vector_store %arg6[%c0_11, %c0_12], %12 {strides = array<i32>} : memref<8x8xf32, #tpu.memory_space<vmem>>, vector<8x8xf32>,
    return
  }
  func.func @transform_0(%arg0: i32) -> (i32, i32) {
    %c0_i32 = arith.constant 0 : i32
    %c0_i32_0 = arith.constant 0 : i32
    return %arg0, %c0_i32 : i32, i32
  }
  func.func @transform_1(%arg0: i32) -> (i32, i32) {
    %c0_i32 = arith.constant 0 : i32
    %c0_i32_0 = arith.constant 0 : i32
    %c0_i32_1 = arith.constant 0 : i32
    return %c0_i32, %c0_i32_0 : i32, i32
  }
  func.func @transform_2(%arg0: i32) -> (i32, i32) {
    %c0_i32 = arith.constant 0 : i32
    %c0_i32_0 = arith.constant 0 : i32
    %c0_i32_1 = arith.constant 0 : i32
    return %c0_i32, %c0_i32_0 : i32, i32
  }
  func.func @transform_3(%arg0: i32) -> (i32, i32) {
    %c0_i32 = arith.constant 0 : i32
    %c0_i32_0 = arith.constant 0 : i32
    %c0_i32_1 = arith.constant 0 : i32
    return %c0_i32, %c0_i32_0 : i32, i32
  }
  func.func @transform_4(%arg0: i32) -> (i32, i32) {
    %c0_i32 = arith.constant 0 : i32
    %c0_i32_0 = arith.constant 0 : i32
    %c0_i32_1 = arith.constant 0 : i32
    return %c0_i32, %c0_i32_0 : i32, i32
  }
  func.func @transform_5(%arg0: i32) -> (i32, i32) {
    %c0_i32 = arith.constant 0 : i32
    %c0_i32_0 = arith.constant 0 : i32
    return %arg0, %c0_i32 : i32, i32
  }
}

module attributes {stable_mosaic.version = 11 : i64} {
  func.func @mlp_kernel(%arg0: i32, %arg1: memref<8x32xf32, #tpu.memory_space<vmem>>, %arg2: memref<32x64xf32, #tpu.memory_space<vmem>>, %arg3: memref<1x64xf32, #tpu.memory_space<vmem>>, %arg4: memref<64x8xf32, #tpu.memory_space<vmem>>, %arg5: memref<1x8xf32, #tpu.memory_space<vmem>>, %arg6: memref<8x8xf32, #tpu.memory_space<vmem>>) attributes {dimension_semantics = [#tpu.dimension_semantics<parallel>], iteration_bounds = array<i64: 1>, scalar_prefetch = 0 : i64, scratch_operands = 0 : i64, tpu.core_type = #tpu.core_type<tc>, window_params = [{transform_indices = @transform_0, window_bounds = array<i64: 8, 32>}, {pipeline_mode = #tpu.pipeline_mode<synchronous>, transform_indices = @transform_1, window_bounds = array<i64: 32, 64>}, {pipeline_mode = #tpu.pipeline_mode<synchronous>, transform_indices = @transform_2, window_bounds = array<i64: 1, 64>}, {pipeline_mode = #tpu.pipeline_mode<synchronous>, transform_indices = @transform_3, window_bounds = array<i64: 64, 8>}, {pipeline_mode = #tpu.pipeline_mode<synchronous>, transform_indices = @transform_4, window_bounds = array<i64: 1, 8>}, {transform_indices = @transform_5, window_bounds = array<i64: 8, 8>}]} {
    %c0 = arith.constant 0 : index
    %c0_0 = arith.constant 0 : index
    %0 = vector.load %arg1[%c0, %c0_0] : memref<8x32xf32, #tpu.memory_space<vmem>>, vector<8x32xf32>
    %c0_1 = arith.constant 0 : index
    %c0_2 = arith.constant 0 : index
    %1 = vector.load %arg2[%c0_1, %c0_2] : memref<32x64xf32, #tpu.memory_space<vmem>>, vector<32x64xf32>
    %cst = arith.constant dense<0.000000e+00> : vector<8x64xf32>
    %2 = tpu.matmul %0, %1, %cst {dimension_numbers = #tpu.dot_dimension_numbers<[1], [0], [0], [1], [0, 0, 1, 1], [], []>} : vector<8x32xf32>, vector<32x64xf32>, vector<8x64xf32> -> vector<8x64xf32>
    %c0_3 = arith.constant 0 : index
    %c0_4 = arith.constant 0 : index
    %3 = vector.load %arg3[%c0_3, %c0_4] : memref<1x64xf32, #tpu.memory_space<vmem>>, vector<1x64xf32>
    %4 = vector.broadcast %3 : vector<1x64xf32> to vector<8x64xf32>
    %5 = arith.addf %2, %4 : vector<8x64xf32>
    %cst_5 = arith.constant 0.000000e+00 : f32
    %6 = vector.broadcast %cst_5 : f32 to vector<8x64xf32>
    %7 = arith.maximumf %5, %6 : vector<8x64xf32>
    %c0_6 = arith.constant 0 : index
    %c0_7 = arith.constant 0 : index
    %8 = vector.load %arg4[%c0_6, %c0_7] : memref<64x8xf32, #tpu.memory_space<vmem>>, vector<64x8xf32>
    %cst_8 = arith.constant dense<0.000000e+00> : vector<8x8xf32>
    %9 = tpu.matmul %7, %8, %cst_8 {dimension_numbers = #tpu.dot_dimension_numbers<[1], [0], [0], [1], [0, 0, 1, 1], [], []>} : vector<8x64xf32>, vector<64x8xf32>, vector<8x8xf32> -> vector<8x8xf32>
    %c0_9 = arith.constant 0 : index
    %c0_10 = arith.constant 0 : index
    %10 = vector.load %arg5[%c0_9, %c0_10] : memref<1x8xf32, #tpu.memory_space<vmem>>, vector<1x8xf32>
    %11 = vector.broadcast %10 : vector<1x8xf32> to vector<8x8xf32>
    %12 = arith.addf %9, %11 : vector<8x8xf32>
    %c0_11 = arith.constant 0 : index
    %c0_12 = arith.constant 0 : index
    %13 = vector.load %arg6[%c0_11, %c0_12] : memref<8x8xf32, #tpu.memory_space<vmem>>, vector<8x8xf32>
    tpu.vector_store %arg6[%c0_11, %c0_12], %12 {strides = array<i32>} : memref<8x8xf32, #tpu.memory_space<vmem>>, vector<8x8xf32>,
    return
  }
  func.func @transform_0(%arg0: i32) -> (i32, i32) {
    %c0_i32 = arith.constant 0 : i32
    %c0_i32_0 = arith.constant 0 : i32
    return %arg0, %c0_i32 : i32, i32
  }
  func.func @transform_1(%arg0: i32) -> (i32, i32) {
    %c0_i32 = arith.constant 0 : i32
    %c0_i32_0 = arith.constant 0 : i32
    %c0_i32_1 = arith.constant 0 : i32
    return %c0_i32, %c0_i32_0 : i32, i32
  }
  func.func @transform_2(%arg0: i32) -> (i32, i32) {
    %c0_i32 = arith.constant 0 : i32
    %c0_i32_0 = arith.constant 0 : i32
    %c0_i32_1 = arith.constant 0 : i32
    return %c0_i32, %c0_i32_0 : i32, i32
  }
  func.func @transform_3(%arg0: i32) -> (i32, i32) {
    %c0_i32 = arith.constant 0 : i32
    %c0_i32_0 = arith.constant 0 : i32
    %c0_i32_1 = arith.constant 0 : i32
    return %c0_i32, %c0_i32_0 : i32, i32
  }
  func.func @transform_4(%arg0: i32) -> (i32, i32) {
    %c0_i32 = arith.constant 0 : i32
    %c0_i32_0 = arith.constant 0 : i32
    %c0_i32_1 = arith.constant 0 : i32
    return %c0_i32, %c0_i32_0 : i32, i32
  }
  func.func @transform_5(%arg0: i32) -> (i32, i32) {
    %c0_i32 = arith.constant 0 : i32
    %c0_i32_0 = arith.constant 0 : i32
    return %arg0, %c0_i32 : i32, i32
  }
}

</mosaic_0001>

<bundles_post_ra>
// kernel: tpu_custom_call.1
= control target key start
LH: loop header
LB: loop body
LE: loop exit
PB: predicated region body
PF: predicated region fallthrough
CT: control target
= control target key end

     0   :  { %s219_s0 = inlined_call_operand.vmem [shape: f32[8,32], index: 0, kind: input, shape index: {}]   ;;  %s220_s1 = inlined_call_operand.vmem [shape: f32[32,64], index: 1, kind: input, shape index: {}]   ;;  %s221_s2 = inlined_call_operand.vmem [shape: f32[1,64], index: 2, kind: input, shape index: {}]   ;;  %s222_s3 = inlined_call_operand.vmem [shape: f32[64,8], index: 3, kind: input, shape index: {}]   ;;  %s223_s4 = inlined_call_operand.vmem [shape: f32[1,8], index: 4, kind: input, shape index: {}]   ;;  %s224_s5 = inlined_call_operand.hbm [shape: f32[8,8], index: 5, kind: output, shape index: {}]  }
   0x1   :  { %v25_v0 = vld [vmem:[%s220_s1 + $0x18] sm:$0xff]  ;;  %v24_v1 = vld [vmem:[%s220_s1 + $0x10] sm:$0xff]  ;;  %v23_v3 = vld [vmem:[%s220_s1 + $0x8] sm:$0xff] }
   0x2   :  { %46 = vmatpush.msra.mxu0 %v25_v0  ;;  %v62_v2 = vld [vmem:[%s222_s3 + $0x38] sm:$0xff]  ;;  %v61_v4 = vld [vmem:[%s222_s3 + $0x30] sm:$0xff]  ;;  %v60_v5 = vld [vmem:[%s222_s3 + $0x28] sm:$0xff] }
   0x3   :  { %79 = vmatpush.msra.mxu1 %v62_v2  ;;  %v22_v6 = vld [vmem:[%s220_s1] sm:$0xff] }
   0x4   :  { %47 = vmatpush.msra.mxu0 %v24_v1 }
   0x5   :  { %80 = vmatpush.msra.mxu1 %v61_v4 }
   0x6   :  { %10 = vsyncpa [#allocation3], 0  ;;  %48 = vmatpush.msra.mxu0 %v23_v3  ;;  %v21_v7 = vld [vmem:[%s219_s0] sm:$0xff]  ;;  %vm30_vm0 = vcmask 261120   ;;  %v58_v9 = vld [vmem:[%s222_s3 + $0x18] sm:$0xff]  ;;  %vm67_vm1 = vcmask 523264  }
   0x7   :  { %v59_v8 = vld [vmem:[%s222_s3 + $0x20] sm:$0xff]  ;;  %81 = vmatpush.msra.mxu1 %v60_v5  ;;  %v57_v10 = vld [vmem:[%s222_s3 + $0x10] sm:$0xff]  ;;  %v56_v11 = vld [vmem:[%s222_s3 + $0x8] sm:$0xff]  ;;  %s140_s21 = smov [#allocation2]   ;;  %vm91_vm2 = vcmask 64512  }
   0x8   :  { %49 = vmatpush.msra.mxu0 %v22_v6  ;;  %v55_v12 = vld [vmem:[%s222_s3] sm:$0xff]  ;;  %s98_s22 = sshll.u32 %s140_s21, 4  ;;  %s100_s3 = sshll.u32 %s224_s5, 4  ;;  %s99_s22 = int_to_ptr.vmem [resolvable:$true] %s98_s22  ;;  %s101_s3 = int_to_ptr.hbm [resolvable:$true] %s100_s3 }
   0x9   :  { %109 = vmatmul.msk.f32.vlgmr.msra.gmra.mxu0 %vm30_vm0, %v21_v7  ;;  %82 = vmatpush.msra.mxu1 %v59_v8  ;;  %v112_v13 = vld [vmem:[%s221_s2] ss:$0 sm:$0xff] }
   0xa   :  { %v113_v17 = vld [vmem:[%s223_s4] ss:$0 sm:$0xff] }
   0xb   :  { %83 = vmatpush.msra.mxu1 %v58_v9 }
   0xd   :  { %84 = vmatpush.msra.mxu1 %v57_v10 }
   0xf   :  { %85 = vmatpush.msra.mxu1 %v56_v11 }
  0x11   :  { %86 = vmatpush.msra.mxu1 %v55_v12 }
  0x86   :  { %v51_v14 = vpop.f32.mrf.mxu0 }
  0x87   :  { %v52_v15 = vadd.f32 %v112_v13, %v51_v14 }
  0x89   :  { %v54_v16 = vmax.f32 %v52_v15, 0.0 }
  0x8b   :  { %110 = vmatmul.msk.f32.vlgmr.msra.gmra.mxu1 %vm67_vm1, %v54_v16 }
 0x108   :  { %v88_v18 = vpop.f32.mrf.mxu1 }
 0x109   :  { %v89_v19 = vadd.f32 %v113_v17, %v88_v18 }
 0x10b   :  { %92 = vst.msk [vmem:[#allocation2] sm:$0xff] %vm91_vm2, %v89_v19 }
 0x10c   :  { %103 = dma.vmem_to_hbm [thread:$0]  %s99_s22, 128, %s101_s3, [#allocation3]  }
 0x10d   :  { %138 = dma.done.wait [#allocation3], 128  }
 0x10e   :  { %139 = vsyncadd [#allocation3], 4294967168 }
 0x10f   :  { %108 = vsyncpa [#allocation3], 1 }

// kernel: tpu_custom_call.1
= control target key start
LH: loop header
LB: loop body
LE: loop exit
PB: predicated region body
PF: predicated region fallthrough
CT: control target
= control target key end

     0   :  { %s219_s0 = inlined_call_operand.vmem [shape: f32[8,32], index: 0, kind: input, shape index: {}]   ;;  %s220_s1 = inlined_call_operand.vmem [shape: f32[32,64], index: 1, kind: input, shape index: {}]   ;;  %s221_s2 = inlined_call_operand.vmem [shape: f32[1,64], index: 2, kind: input, shape index: {}]   ;;  %s222_s3 = inlined_call_operand.vmem [shape: f32[64,8], index: 3, kind: input, shape index: {}]   ;;  %s223_s4 = inlined_call_operand.vmem [shape: f32[1,8], index: 4, kind: input, shape index: {}]   ;;  %s224_s5 = inlined_call_operand.hbm [shape: f32[8,8], index: 5, kind: output, shape index: {}]  }
   0x1   :  { %v25_v0 = vld [vmem:[%s220_s1 + $0x18] sm:$0xff]  ;;  %v24_v1 = vld [vmem:[%s220_s1 + $0x10] sm:$0xff]  ;;  %v23_v3 = vld [vmem:[%s220_s1 + $0x8] sm:$0xff] }
   0x2   :  { %46 = vmatpush.msra.mxu0 %v25_v0  ;;  %v62_v2 = vld [vmem:[%s222_s3 + $0x38] sm:$0xff]  ;;  %v61_v4 = vld [vmem:[%s222_s3 + $0x30] sm:$0xff]  ;;  %v60_v5 = vld [vmem:[%s222_s3 + $0x28] sm:$0xff] }
   0x3   :  { %79 = vmatpush.msra.mxu1 %v62_v2  ;;  %v22_v6 = vld [vmem:[%s220_s1] sm:$0xff] }
   0x4   :  { %47 = vmatpush.msra.mxu0 %v24_v1 }
   0x5   :  { %80 = vmatpush.msra.mxu1 %v61_v4 }
   0x6   :  { %10 = vsyncpa [#allocation3], 0  ;;  %48 = vmatpush.msra.mxu0 %v23_v3  ;;  %v21_v7 = vld [vmem:[%s219_s0] sm:$0xff]  ;;  %vm30_vm0 = vcmask 261120   ;;  %v58_v9 = vld [vmem:[%s222_s3 + $0x18] sm:$0xff]  ;;  %vm67_vm1 = vcmask 523264  }
   0x7   :  { %v59_v8 = vld [vmem:[%s222_s3 + $0x20] sm:$0xff]  ;;  %81 = vmatpush.msra.mxu1 %v60_v5  ;;  %v57_v10 = vld [vmem:[%s222_s3 + $0x10] sm:$0xff]  ;;  %v56_v11 = vld [vmem:[%s222_s3 + $0x8] sm:$0xff]  ;;  %s140_s21 = smov [#allocation2]   ;;  %vm91_vm2 = vcmask 64512  }
   0x8   :  { %49 = vmatpush.msra.mxu0 %v22_v6  ;;  %v55_v12 = vld [vmem:[%s222_s3] sm:$0xff]  ;;  %s98_s22 = sshll.u32 %s140_s21, 4  ;;  %s100_s3 = sshll.u32 %s224_s5, 4  ;;  %s99_s22 = int_to_ptr.vmem [resolvable:$true] %s98_s22  ;;  %s101_s3 = int_to_ptr.hbm [resolvable:$true] %s100_s3 }
   0x9   :  { %109 = vmatmul.msk.f32.vlgmr.msra.gmra.mxu0 %vm30_vm0, %v21_v7  ;;  %82 = vmatpush.msra.mxu1 %v59_v8  ;;  %v112_v13 = vld [vmem:[%s221_s2] ss:$0 sm:$0xff] }
   0xa   :  { %v113_v17 = vld [vmem:[%s223_s4] ss:$0 sm:$0xff] }
   0xb   :  { %83 = vmatpush.msra.mxu1 %v58_v9 }
   0xd   :  { %84 = vmatpush.msra.mxu1 %v57_v10 }
   0xf   :  { %85 = vmatpush.msra.mxu1 %v56_v11 }
  0x11   :  { %86 = vmatpush.msra.mxu1 %v55_v12 }
  0x86   :  { %v51_v14 = vpop.f32.mrf.mxu0 }
  0x87   :  { %v52_v15 = vadd.f32 %v112_v13, %v51_v14 }
  0x89   :  { %v54_v16 = vmax.f32 %v52_v15, 0.0 }
  0x8b   :  { %110 = vmatmul.msk.f32.vlgmr.msra.gmra.mxu1 %vm67_vm1, %v54_v16 }
 0x108   :  { %v88_v18 = vpop.f32.mrf.mxu1 }
 0x109   :  { %v89_v19 = vadd.f32 %v113_v17, %v88_v18 }
 0x10b   :  { %92 = vst.msk [vmem:[#allocation2] sm:$0xff] %vm91_vm2, %v89_v19 }
 0x10c   :  { %103 = dma.vmem_to_hbm [thread:$0]  %s99_s22, 128, %s101_s3, [#allocation3]  }
 0x10d   :  { %138 = dma.done.wait [#allocation3], 128  }
 0x10e   :  { %139 = vsyncadd [#allocation3], 4294967168 }
 0x10f   :  { %108 = vsyncpa [#allocation3], 1 }

</bundles_post_ra>
